<compile_context>
chip_gen: v6e
topology: v6e:2x2x1
jax: 0.10.0
libtpu: 0.0.40
codegen_flags: <defaults>
</compile_context>

<pallas_src>
import jax
import jax.numpy as jnp
from jax import lax
from jax.experimental import pallas as pl
from jax.experimental.pallas import tpu as pltpu


def _make_classifier_kernel(hw_chunk, n_chunks):
    def kernel(x_ref, w1_ref, b1_ref, w2_ref, b2_ref, y_ref):
        # x_ref : (Bt, C, HW)  f32   activations, HW on the lane axis
        # w1_ref: (C, F, 1)    f32   1x1-conv weight (per-channel column, F on sublanes)
        # b1_ref: (F, 1)       f32   conv bias
        # w2_ref: (F, NCp)     bf16  fc2 weight (lane-padded, resident)
        # b2_ref: (1, NCp)     f32   fc2 bias   (lane-padded, resident)
        # y_ref : (Bt, NCp)    f32   logits
        Bt, C, HW = x_ref.shape
        F = w1_ref.shape[1]

        # Hoist resident weight loads out of the chunk loop.
        w1 = w1_ref[...]                      # (C, F, 1)
        b1 = b1_ref[...]                      # (F, 1)

        def chunk_feat_sum(x_chunk):
            # encoder.forward_features: pointwise (1x1) conv as a C-term VPU
            # broadcast-FMA chain (tiny K -> skip the MXU round trip), then
            # bias + ReLU and a lane-axis (XLU) partial sum over the chunk.
            fm = x_chunk[:, 0:1, :].astype(jnp.float32) * w1[0]      # (Bt, F, ch)
            for c in range(1, C):
                fm = fm + x_chunk[:, c:c + 1, :].astype(jnp.float32) * w1[c]
            fm = jnp.maximum(fm + b1, 0.0)
            return jnp.sum(fm, axis=-1)                              # (Bt, F)

        if n_chunks == 1:
            feat_sum = chunk_feat_sum(x_ref[...])
        else:
            def body(ci, acc):
                start = pl.multiple_of(ci * hw_chunk, hw_chunk)
                return acc + chunk_feat_sum(x_ref[:, :, pl.ds(start, hw_chunk)])
            feat_sum = lax.fori_loop(0, n_chunks, body,
                                     jnp.zeros((Bt, F), jnp.float32),
                                     unroll=True)

        # AdaptiveAvgPool2dCustom((1,1)) + flatten(1): global mean over HW.
        feat = feat_sum * (1.0 / float(HW))                          # (Bt, F)

        # Dropout(drop_rate): eval-mode identity.
        # TODO(synk): training-mode dropout (pltpu.prng_random_bits mask + 1/(1-p) scale).

        # fc2: Linear(num_features -> num_classes). bf16 inputs, f32 accumulate
        # (single-pass MXU on v5e/v6e/v7x; K=F is tiny so precision impact is negligible).
        y = jnp.dot(feat.astype(jnp.bfloat16), w2_ref[...],
                    preferred_element_type=jnp.float32) + b2_ref[...]
        y_ref[...] = y.astype(y_ref.dtype)                           # lane-dense store

    return kernel


def base_classifier_forward(x_nchw, w1, b1, w2, b2):
    """x_nchw: (B, C, H, W) float32. w1: (C, F), b1: (F,), w2: (F, NC), b2: (NC,).

    Returns logits (B, NC) in float32."""
    B, C, H, W = x_nchw.shape
    F = w1.shape[1]
    NC = w2.shape[1]
    HW = H * W

    assert w1.shape == (C, F), f"conv weight shape {w1.shape} != {(C, F)}"
    assert w2.shape == (F, NC), f"fc2 weight shape {w2.shape} != {(F, NC)}"
    assert b1.size == F, f"conv bias has {b1.size} elems, expected {F}"
    assert b2.size == NC, f"fc2 bias has {b2.size} elems, expected {NC}"

    # ---- batch-block policy (VMEM-budgeted, large blocks) ----
    # ~0.35us per grid step, so amortize with big batch blocks. Cap the
    # double-buffered f32 activation block at ~8 MiB so the kernel stays well
    # inside v7x's 64 MiB physical / 32 MiB scoped VMEM (v5e/v6e have more).
    act_budget = 8 << 20
    bt_cap = max(8, act_budget // (2 * C * HW * 4))
    bt_max = int(min(256, (bt_cap // 8) * 8))
    if B <= bt_max:
        Bt = B                    # single grid step: best on 1-TC v5e/v6e, and a tiny
                                  # split buys nothing on v7x either
    elif B <= 2 * bt_max:
        Bt = min(bt_max, ((pl.cdiv(B, 2) + 7) // 8) * 8)   # two big blocks -> both v7x TCs busy
    else:
        Bt = bt_max
    num_blocks = pl.cdiv(B, Bt)   # ragged last block: Pallas masks the out-of-range write

    # NCHW -> (B, C, H*W): free, contiguous reshape; HW (multiple of 128 here)
    # lands on the lane axis so the streaming DMA and vregs are lane-dense.
    x_r = x_nchw.reshape(B, C, HW)

    # Pad classifier width to a multiple of 128 -> unmasked lane-dense output
    # store (zero weights/bias => zero logits in the padding, sliced off below).
    NCp = pl.cdiv(NC, 128) * 128
    w2_p = jnp.pad(w2, ((0, 0), (0, NCp - NC))).astype(jnp.bfloat16)   # resident; one-time tiny cast
    b2_p = jnp.pad(b2.reshape(1, NC), ((0, 0), (0, NCp - NC))).astype(jnp.float32)

    # Conv weight as (C, F, 1): each channel's column is sublane-major so the
    # in-kernel lane-broadcast multiply needs no relayout.
    w1_r = w1.reshape(C, F, 1).astype(jnp.float32)
    b1_r = b1.reshape(F, 1).astype(jnp.float32)

    # Bound the live (Bt, F, hw_chunk) f32 feature-map intermediate to ~4 MiB by
    # chunking the spatial axis (lane-aligned chunks that divide HW).
    fm_budget = 4 << 20
    hw_chunk = HW
    if Bt * F * HW * 4 > fm_budget and HW % 128 == 0:
        hw_chunk = 128
        while HW % (hw_chunk * 2) == 0 and Bt * F * (hw_chunk * 2) * 4 <= fm_budget:
            hw_chunk *= 2
    n_chunks = HW // hw_chunk

    kernel = _make_classifier_kernel(hw_chunk, n_chunks)

    grid_spec = pltpu.PrefetchScalarGridSpec(
        num_scalar_prefetch=0,
        grid=(num_blocks,),
        in_specs=[
            # Streamed activations (only streaming input). If profiling shows the
            # DMA exposed at large Bt, add pipeline_mode=pl.Buffered(3) here.
            pl.BlockSpec((Bt, C, HW), lambda i: (i, 0, 0)),
            pl.BlockSpec((C, F, 1), lambda i: (0, 0, 0)),     # conv weight (resident)
            pl.BlockSpec((F, 1), lambda i: (0, 0)),           # conv bias (resident)
            pl.BlockSpec((F, NCp), lambda i: (0, 0)),         # fc2 weight (resident, bf16)
            pl.BlockSpec((1, NCp), lambda i: (0, 0)),         # fc2 bias (resident)
        ],
        out_specs=pl.BlockSpec((Bt, NCp), lambda i: (i, 0)),
    )

    y_p = pl.pallas_call(
        kernel,
        out_shape=jax.ShapeDtypeStruct((B, NCp), jnp.float32),
        grid_spec=grid_spec,
        compiler_params=pltpu.CompilerParams(dimension_semantics=("parallel",)),
    )(x_r, w1_r, b1_r, w2_p, b2_p)

    return y_p[:, :NC]


def _reference(x_nchw, w1, b1, w2, b2):
    # Pure-f32 forward matching the PyTorch module (eval-mode dropout = identity).
    fm = jnp.einsum("bchw,cf->bfhw", x_nchw, w1) + b1.reshape(1, -1, 1, 1)
    fm = jnp.maximum(fm, 0.0)
    feat = fm.mean(axis=(2, 3))                       # AdaptiveAvgPool2d((1,1)) + flatten
    return feat @ w2 + b2.reshape(1, -1)


if __name__ == "__main__":
    # Small shapes consistent with the module: batch=2, in-channels=4, spatial=16x16,
    # encoder num_features=32, num_classes=20.
    B, C, H, W = 2, 4, 16, 16
    F, NC = 32, 20

    key = jax.random.PRNGKey(0)
    kx, k1, kb1, k2, kb2 = jax.random.split(key, 5)

    x = jax.random.normal(kx, (B, C, H, W), dtype=jnp.float32)

    # Deterministic synthetic parameters (shapes as the module's __init__ implies).
    w1 = jax.random.normal(k1, (C, F), dtype=jnp.float32) * 0.1       # 1x1 conv weight (encoder)
    b1 = jax.random.normal(kb1, (F,), dtype=jnp.float32) * 0.1        # conv bias
    w2 = jax.random.normal(k2, (F, NC), dtype=jnp.float32) * 0.001    # fc2 weight (F -> NC)
    b2 = jax.random.normal(kb2, (NC,), dtype=jnp.float32) * 0.01      # fc2 bias

    y = jax.block_until_ready(base_classifier_forward(x, w1, b1, w2, b2))

    y_ref = _reference(x, w1, b1, w2, b2)
    assert y.shape == (B, NC)
    # Activations and pooling are f32 end-to-end; the only deviation from the
    # pure-f32 reference is the bf16-input / f32-accumulate fc2 matmul.
    assert jnp.allclose(y, y_ref, atol=1e-4, rtol=1e-3), float(jnp.max(jnp.abs(y - y_ref)))

    print("KERNEL_OK")
</pallas_src>

<mosaic_0001>
module attributes {stable_mosaic.version = 11 : i64} {
  func.func @kernel(%arg0: i32, %arg1: memref<2x4x256xf32, #tpu.memory_space<vmem>>, %arg2: memref<4x32x1xf32, #tpu.memory_space<vmem>>, %arg3: memref<32x1xf32, #tpu.memory_space<vmem>>, %arg4: memref<32x128xbf16, #tpu.memory_space<vmem>>, %arg5: memref<1x128xf32, #tpu.memory_space<vmem>>, %arg6: memref<2x128xf32, #tpu.memory_space<vmem>>) attributes {dimension_semantics = [#tpu.dimension_semantics<parallel>], iteration_bounds = array<i64: 1>, scalar_prefetch = 0 : i64, scratch_operands = 0 : i64, tpu.core_type = #tpu.core_type<tc>, window_params = [{transform_indices = @transform_0, window_bounds = array<i64: 2, 4, 256>}, {pipeline_mode = #tpu.pipeline_mode<synchronous>, transform_indices = @transform_1, window_bounds = array<i64: 4, 32, 1>}, {pipeline_mode = #tpu.pipeline_mode<synchronous>, transform_indices = @transform_2, window_bounds = array<i64: 32, 1>}, {pipeline_mode = #tpu.pipeline_mode<synchronous>, transform_indices = @transform_3, window_bounds = array<i64: 32, 128>}, {pipeline_mode = #tpu.pipeline_mode<synchronous>, transform_indices = @transform_4, window_bounds = array<i64: 1, 128>}, {transform_indices = @transform_5, window_bounds = array<i64: 2, 128>}]} {
    %c0 = arith.constant 0 : index
    %c0_0 = arith.constant 0 : index
    %c0_1 = arith.constant 0 : index
    %0 = vector.load %arg2[%c0, %c0_0, %c0_1] : memref<4x32x1xf32, #tpu.memory_space<vmem>>, vector<4x32x1xf32>
    %c0_2 = arith.constant 0 : index
    %c0_3 = arith.constant 0 : index
    %1 = vector.load %arg3[%c0_2, %c0_3] : memref<32x1xf32, #tpu.memory_space<vmem>>, vector<32x1xf32>
    %c0_4 = arith.constant 0 : index
    %c0_5 = arith.constant 0 : index
    %c0_6 = arith.constant 0 : index
    %2 = vector.load %arg1[%c0_4, %c0_5, %c0_6] : memref<2x4x256xf32, #tpu.memory_space<vmem>>, vector<2x4x256xf32>
    %3 = vector.extract_strided_slice %2 {offsets = [0, 0, 0], sizes = [2, 1, 256], strides = [1, 1, 1]} : vector<2x4x256xf32> to vector<2x1x256xf32>
    %4 = vector.extract_strided_slice %0 {offsets = [0, 0, 0], sizes = [1, 32, 1], strides = [1, 1, 1]} : vector<4x32x1xf32> to vector<1x32x1xf32>
    %5 = vector.shape_cast %4 : vector<1x32x1xf32> to vector<32x1xf32>
    %6 = vector.shape_cast %5 : vector<32x1xf32> to vector<1x32x1xf32>
    %7 = vector.broadcast %3 : vector<2x1x256xf32> to vector<2x32x256xf32>
    %8 = vector.broadcast %6 : vector<1x32x1xf32> to vector<2x32x256xf32>
    %9 = arith.mulf %7, %8 : vector<2x32x256xf32>
    %10 = vector.extract_strided_slice %2 {offsets = [0, 1, 0], sizes = [2, 1, 256], strides = [1, 1, 1]} : vector<2x4x256xf32> to vector<2x1x256xf32>
    %11 = vector.extract_strided_slice %0 {offsets = [1, 0, 0], sizes = [1, 32, 1], strides = [1, 1, 1]} : vector<4x32x1xf32> to vector<1x32x1xf32>
    %12 = vector.shape_cast %11 : vector<1x32x1xf32> to vector<32x1xf32>
    %13 = vector.shape_cast %12 : vector<32x1xf32> to vector<1x32x1xf32>
    %14 = vector.broadcast %10 : vector<2x1x256xf32> to vector<2x32x256xf32>
    %15 = vector.broadcast %13 : vector<1x32x1xf32> to vector<2x32x256xf32>
    %16 = arith.mulf %14, %15 : vector<2x32x256xf32>
    %17 = arith.addf %9, %16 : vector<2x32x256xf32>
    %18 = vector.extract_strided_slice %2 {offsets = [0, 2, 0], sizes = [2, 1, 256], strides = [1, 1, 1]} : vector<2x4x256xf32> to vector<2x1x256xf32>
    %19 = vector.extract_strided_slice %0 {offsets = [2, 0, 0], sizes = [1, 32, 1], strides = [1, 1, 1]} : vector<4x32x1xf32> to vector<1x32x1xf32>
    %20 = vector.shape_cast %19 : vector<1x32x1xf32> to vector<32x1xf32>
    %21 = vector.shape_cast %20 : vector<32x1xf32> to vector<1x32x1xf32>
    %22 = vector.broadcast %18 : vector<2x1x256xf32> to vector<2x32x256xf32>
    %23 = vector.broadcast %21 : vector<1x32x1xf32> to vector<2x32x256xf32>
    %24 = arith.mulf %22, %23 : vector<2x32x256xf32>
    %25 = arith.addf %17, %24 : vector<2x32x256xf32>
    %26 = vector.extract_strided_slice %2 {offsets = [0, 3, 0], sizes = [2, 1, 256], strides = [1, 1, 1]} : vector<2x4x256xf32> to vector<2x1x256xf32>
    %27 = vector.extract_strided_slice %0 {offsets = [3, 0, 0], sizes = [1, 32, 1], strides = [1, 1, 1]} : vector<4x32x1xf32> to vector<1x32x1xf32>
    %28 = vector.shape_cast %27 : vector<1x32x1xf32> to vector<32x1xf32>
    %29 = vector.shape_cast %28 : vector<32x1xf32> to vector<1x32x1xf32>
    %30 = vector.broadcast %26 : vector<2x1x256xf32> to vector<2x32x256xf32>
    %31 = vector.broadcast %29 : vector<1x32x1xf32> to vector<2x32x256xf32>
    %32 = arith.mulf %30, %31 : vector<2x32x256xf32>
    %33 = arith.addf %25, %32 : vector<2x32x256xf32>
    %34 = vector.shape_cast %1 : vector<32x1xf32> to vector<1x32x1xf32>
    %35 = vector.broadcast %34 : vector<1x32x1xf32> to vector<2x32x256xf32>
    %36 = arith.addf %33, %35 : vector<2x32x256xf32>
    %cst = arith.constant 0.000000e+00 : f32
    %37 = vector.broadcast %cst : f32 to vector<2x32x256xf32>
    %38 = arith.maximumf %36, %37 : vector<2x32x256xf32>
    %cst_7 = arith.constant dense<0.000000e+00> : vector<2x32xf32>
    %39 = vector.multi_reduction <add>, %38, %cst_7 [2] : vector<2x32x256xf32> to vector<2x32xf32>
    %cst_8 = arith.constant 3.906250e-03 : f32
    %40 = vector.broadcast %cst_8 : f32 to vector<2x32xf32>
    %41 = arith.mulf %39, %40 : vector<2x32xf32>
    %42 = arith.truncf %41 : vector<2x32xf32> to vector<2x32xbf16>
    %c0_9 = arith.constant 0 : index
    %c0_10 = arith.constant 0 : index
    %43 = vector.load %arg4[%c0_9, %c0_10] : memref<32x128xbf16, #tpu.memory_space<vmem>>, vector<32x128xbf16>
    %cst_11 = arith.constant dense<0.000000e+00> : vector<2x128xf32>
    %44 = tpu.matmul %42, %43, %cst_11 {dimension_numbers = #tpu.dot_dimension_numbers<[1], [0], [0], [1], [0, 0, 1, 1], [], []>} : vector<2x32xbf16>, vector<32x128xbf16>, vector<2x128xf32> -> vector<2x128xf32>
    %c0_12 = arith.constant 0 : index
    %c0_13 = arith.constant 0 : index
    %45 = vector.load %arg5[%c0_12, %c0_13] : memref<1x128xf32, #tpu.memory_space<vmem>>, vector<1x128xf32>
    %46 = vector.broadcast %45 : vector<1x128xf32> to vector<2x128xf32>
    %47 = arith.addf %44, %46 : vector<2x128xf32>
    %c0_14 = arith.constant 0 : index
    %c0_15 = arith.constant 0 : index
    %48 = vector.load %arg6[%c0_14, %c0_15] : memref<2x128xf32, #tpu.memory_space<vmem>>, vector<2x128xf32>
    tpu.vector_store %arg6[%c0_14, %c0_15], %47 {strides = array<i32>} : memref<2x128xf32, #tpu.memory_space<vmem>>, vector<2x128xf32>,
    return
  }
  func.func @transform_0(%arg0: i32) -> (i32, i32, i32) {
    %c0_i32 = arith.constant 0 : i32
    %c0_i32_0 = arith.constant 0 : i32
    %c0_i32_1 = arith.constant 0 : i32
    return %arg0, %c0_i32, %c0_i32_0 : i32, i32, i32
  }
  func.func @transform_1(%arg0: i32) -> (i32, i32, i32) {
    %c0_i32 = arith.constant 0 : i32
    %c0_i32_0 = arith.constant 0 : i32
    %c0_i32_1 = arith.constant 0 : i32
    %c0_i32_2 = arith.constant 0 : i32
    return %c0_i32, %c0_i32_0, %c0_i32_1 : i32, i32, i32
  }
  func.func @transform_2(%arg0: i32) -> (i32, i32) {
    %c0_i32 = arith.constant 0 : i32
    %c0_i32_0 = arith.constant 0 : i32
    %c0_i32_1 = arith.constant 0 : i32
    return %c0_i32, %c0_i32_0 : i32, i32
  }
  func.func @transform_3(%arg0: i32) -> (i32, i32) {
    %c0_i32 = arith.constant 0 : i32
    %c0_i32_0 = arith.constant 0 : i32
    %c0_i32_1 = arith.constant 0 : i32
    return %c0_i32, %c0_i32_0 : i32, i32
  }
  func.func @transform_4(%arg0: i32) -> (i32, i32) {
    %c0_i32 = arith.constant 0 : i32
    %c0_i32_0 = arith.constant 0 : i32
    %c0_i32_1 = arith.constant 0 : i32
    return %c0_i32, %c0_i32_0 : i32, i32
  }
  func.func @transform_5(%arg0: i32) -> (i32, i32) {
    %c0_i32 = arith.constant 0 : i32
    %c0_i32_0 = arith.constant 0 : i32
    return %arg0, %c0_i32 : i32, i32
  }
}

</mosaic_0001>

<bundles_post_ra>
// kernel: tpu_custom_call.1
= control target key start
LH: loop header
LB: loop body
LE: loop exit
PB: predicated region body
PF: predicated region fallthrough
CT: control target
= control target key end

     0   :  { %v658_v2 = vmov 0   ;;  %s864_s0 = inlined_call_operand.vmem [shape: f32[2,4,256], index: 0, kind: input, shape index: {}]   ;;  %s865_s1 = inlined_call_operand.vmem [shape: f32[4,32,1], index: 1, kind: input, shape index: {}]   ;;  %s866_s2 = inlined_call_operand.vmem [shape: f32[32,1], index: 2, kind: input, shape index: {}]   ;;  %s867_s3 = inlined_call_operand.vmem [shape: bf16[32,128], index: 3, kind: input, shape index: {}]   ;;  %s868_s4 = inlined_call_operand.vmem [shape: f32[1,128], index: 4, kind: input, shape index: {}]   ;;  %s869_s5 = inlined_call_operand.hbm [shape: f32[2,128], index: 5, kind: output, shape index: {}]  }
   0x1   :  { %v26_v0 = vld [vmem:[%s865_s1 + $0x20] sm:$0xff]  ;;  %633 = vset.pattern.permute.xlu1 %v658_v2  ;;  %632 = vset.pattern.permute.xlu0 %v658_v2  ;;  %v27_v3 = vld [vmem:[%s865_s1 + $0x28] sm:$0xff]  ;;  %v25_v5 = vld [vmem:[%s865_s1 + $0x18] sm:$0xff] }
   0x2   :  { %v22_v1 = vld [vmem:[%s865_s1] sm:$0xff]  ;;  %156 = vperm.xlu1 %633, %v26_v0   ;;  %v23_v4 = vld [vmem:[%s865_s1 + $0x8] sm:$0xff]  ;;  %v24_v6 = vld [vmem:[%s865_s1 + $0x10] sm:$0xff] }
   0x3   :  { %84 = vperm.xlu0 %632, %v22_v1  }
   0x6   :  { %161 = vperm.xlu1 %633, %v27_v3  }
   0x7   :  { %89 = vperm.xlu0 %632, %v23_v4  }
   0x8   :  { %10 = vsyncpa [#allocation3], 0  ;;  %v29_v7 = vld [vmem:[%s865_s1 + $0x38] sm:$0xff]  ;;  %v28_v8 = vld [vmem:[%s865_s1 + $0x30] sm:$0xff]  ;;  %v46_v21 = vlaneseq  ;;  %vm660_vm0 = vmmov 0   ;;  %vm504_vm1 = vcmask 130112  }
   0x9   :  { %v31_v9 = vld [vmem:[%s865_s1 + $0x48] sm:$0xff]  ;;  %v30_v10 = vld [vmem:[%s865_s1 + $0x40] sm:$0xff]  ;;  %v33_v11 = vld [vmem:[%s865_s1 + $0x58] sm:$0xff]  ;;  %vm511_vm2 = vcmask 195712   ;;  %vm518_vm3 = vcmask 261312   ;;  %vm539_vm4 = vcmask 1041409  }
   0xa   :  { %99 = vperm.xlu1 %633, %v25_v5   ;;  %v32_v12 = vld [vmem:[%s865_s1 + $0x50] sm:$0xff]  ;;  %v35_v13 = vld [vmem:[%s865_s1 + $0x68] sm:$0xff]  ;;  %v34_v14 = vld [vmem:[%s865_s1 + $0x60] sm:$0xff]  ;;  %v753_v22 = vshrl.u32 %v46_v21, 7  ;;  %vm554_vm5 = vcmask 261120   ;;  %s661_s14 = smov [#allocation2]  }
   0xb   :  { %94 = vperm.xlu0 %632, %v24_v6   ;;  %v37_v15 = vld [vmem:[%s865_s1 + $0x78] sm:$0xff]  ;;  %v36_v16 = vld [vmem:[%s865_s1 + $0x70] sm:$0xff]  ;;  %v39_v17 = vld [vmem:[%s866_s2 + $0x8] sm:$0xff]  ;;  %s605_s15 = sshll.u32 %s661_s14, 4  ;;  %s606_s15 = int_to_ptr.vmem [resolvable:$true] %s605_s15 }
   0xc   :  { %v38_v18 = vld [vmem:[%s866_s2] sm:$0xff]  ;;  %v41_v19 = vld [vmem:[%s866_s2 + $0x18] sm:$0xff]  ;;  %v40_v20 = vld [vmem:[%s866_s2 + $0x10] sm:$0xff]  ;;  %v120_v23 = vsub.s32 1, %v753_v22  ;;  %v124_v24 = vsub.s32 5, %v753_v22  ;;  %v48_v27 = vsub.s32 0, %v753_v22  ;;  %p641_p1 = scmp.lt.s32.totalorder %s606_s15, %s606_s15 }
   0xd   :  { %v42_v25 = vld [vmem:[%s864_s0] sm:$0xff]  ;;  %v43_v26 = vld [vmem:[%s864_s0 + $0x8] sm:$0xff]  ;;  %v52_v28 = vsub.s32 4, %v753_v22  ;;  %v208_v37 = vsub.s32 2, %v753_v22  ;;  %v212_v38 = vsub.s32 6, %v753_v22  ;;  %v296_v41 = vsub.s32 3, %v753_v22 }
   0xe   :  { %171 = vperm.xlu1 %633, %v29_v7   ;;  %v121_v29 = vrot.slane %v42_v25, %v120_v23  ;;  %v125_v30 = vrot.slane %v42_v25, %v124_v24  ;;  %v129_v31 = vrot.slane %v43_v26, %v120_v23  ;;  %v133_v32 = vrot.slane %v43_v26, %v124_v24  ;;  %s636_s16 = scalar_lea.vmem %s606_s15, 32 }
   0xf   :  { %166 = vperm.xlu0 %632, %v28_v8   ;;  %v49_v33 = vrot.slane %v42_v25, %v48_v27  ;;  %v53_v34 = vrot.slane %v42_v25, %v52_v28  ;;  %v57_v35 = vrot.slane %v43_v26, %v48_v27  ;;  %v61_v36 = vrot.slane %v43_v26, %v52_v28  ;;  %p637_p0 = scmp.ne.s32.totalorder %s606_s15, %s636_s16  ;;  %p642_p2 = scmp.lt.s32.totalorder %s636_s16, %s636_s16 }
  0x10   :  { %v300_v42 = vsub.s32 7, %v753_v22  ;;  %v769_v43 = vrot.slane %v121_v29, %v120_v23  ;;  %v771_v44 = vrot.slane %v125_v30, %v120_v23  ;;  %v773_v45 = vrot.slane %v129_v31, %v120_v23 }
  0x11   :  { %v775_v46 = vrot.slane %v133_v32, %v120_v23  ;;  %v69_v47 = vrot.slane %v49_v33, %v48_v27  ;;  %v73_v48 = vrot.slane %v53_v34, %v48_v27  ;;  %v77_v49 = vrot.slane %v57_v35, %v48_v27  ;;  %p643_p3 = por %p642_p2, %p641_p1 }
  0x12   :  { %249 = vperm.xlu1 %633, %v31_v9   ;;  %v81_v50 = vrot.slane %v61_v36, %v48_v27  ;;  %v209_v51 = vrot.slane %v42_v25, %v208_v37  ;;  %v213_v52 = vrot.slane %v42_v25, %v212_v38  ;;  %v217_v53 = vrot.slane %v43_v26, %v208_v37 }
  0x13   :  { %244 = vperm.xlu0 %632, %v30_v10   ;;  %v221_v54 = vrot.slane %v43_v26, %v212_v38  ;;  %v297_v57 = vrot.slane %v42_v25, %v296_v41  ;;  %v301_v58 = vrot.slane %v42_v25, %v300_v42  ;;  %v305_v59 = vrot.slane %v43_v26, %v296_v41  ;;  %p644_p4 = pnand %p643_p3, %p637_p0 }
  0x14   :  { %v309_v60 = vrot.slane %v43_v26, %v300_v42 }
  0x15   :  { %v797_v23 = vrot.slane %v305_v59, %v296_v41 }
  0x16   :  { %259 = vperm.xlu1 %633, %v33_v11   ;;  %v799_v24 = vrot.slane %v309_v60, %v296_v41 }
  0x17   :  { %254 = vperm.xlu0 %632, %v32_v12  }
  0x1a   :  { %337 = vperm.xlu1 %633, %v35_v13  }
  0x1b   :  { %332 = vperm.xlu0 %632, %v34_v14  }
  0x1e   :  { %347 = vperm.xlu1 %633, %v37_v15   ;;  %v785_v15 = vrot.slane %v209_v51, %v208_v37 }
  0x1f   :  { %342 = vperm.xlu0 %632, %v36_v16   ;;  %v787_v16 = vrot.slane %v213_v52, %v208_v37 }
  0x22   :  { %389 = vperm.xlu1 %633, %v39_v17   ;;  %v789_v17 = vrot.slane %v217_v53, %v208_v37 }
  0x23   :  { %384 = vperm.xlu0 %632, %v38_v18   ;;  %v791_v18 = vrot.slane %v221_v54, %v208_v37 }
  0x26   :  { %399 = vperm.xlu1 %633, %v41_v19   ;;  %v793_v19 = vrot.slane %v297_v57, %v296_v41 }
  0x27   :  { %394 = vperm.xlu0 %632, %v40_v20   ;;  %v795_v20 = vrot.slane %v301_v58, %v296_v41 }
  0x7d   :  { %v157_v39 = vpop.permute.xlu1 %156 }
  0x7e   :  { %v85_v40 = vpop.permute.xlu0 %84  ;;  %v174_v61 = vmul.f32 %v157_v39, %v769_v43  ;;  %v175_v62 = vmul.f32 %v157_v39, %v771_v44  ;;  %v182_v63 = vmul.f32 %v157_v39, %v773_v45  ;;  %v183_v0 = vmul.f32 %v157_v39, %v775_v46 }
  0x7f   :  { %v102_v1 = vmul.f32 %v85_v40, %v69_v47  ;;  %v103_v2 = vmul.f32 %v85_v40, %v73_v48  ;;  %v110_v3 = vmul.f32 %v85_v40, %v77_v49  ;;  %v111_v4 = vmul.f32 %v85_v40, %v81_v50 }
  0x81   :  { %v162_v55 = vpop.permute.xlu1 %161  ;;  %v190_v25 = vadd.f32 %v174_v61, %v102_v1  ;;  %v191_v26 = vadd.f32 %v175_v62, %v103_v2  ;;  %v198_v27 = vadd.f32 %v182_v63, %v110_v3  ;;  %v199_v28 = vadd.f32 %v183_v0, %v111_v4 }
  0x82   :  { %v90_v56 = vpop.permute.xlu0 %89  ;;  %v176_v5 = vmul.f32 %v162_v55, %v769_v43  ;;  %v177_v6 = vmul.f32 %v162_v55, %v771_v44  ;;  %v184_v7 = vmul.f32 %v162_v55, %v773_v45  ;;  %v185_v8 = vmul.f32 %v162_v55, %v775_v46 }
  0x83   :  { %v104_v9 = vmul.f32 %v90_v56, %v69_v47  ;;  %v105_v10 = vmul.f32 %v90_v56, %v73_v48  ;;  %v112_v11 = vmul.f32 %v90_v56, %v77_v49  ;;  %v113_v12 = vmul.f32 %v90_v56, %v81_v50 }
  0x85   :  { %v100_v13 = vpop.permute.xlu1 %99  ;;  %v192_v29 = vadd.f32 %v176_v5, %v104_v9  ;;  %v193_v30 = vadd.f32 %v177_v6, %v105_v10  ;;  %v200_v31 = vadd.f32 %v184_v7, %v112_v11  ;;  %v201_v32 = vadd.f32 %v185_v8, %v113_v12 }
  0x86   :  { %v95_v14 = vpop.permute.xlu0 %94  ;;  %v108_v35 = vmul.f32 %v100_v13, %v69_v47  ;;  %v109_v36 = vmul.f32 %v100_v13, %v73_v48  ;;  %v116_v37 = vmul.f32 %v100_v13, %v77_v49  ;;  %v117_v38 = vmul.f32 %v100_v13, %v81_v50 }
  0x87   :  { %v106_v51 = vmul.f32 %v95_v14, %v69_v47  ;;  %v107_v52 = vmul.f32 %v95_v14, %v73_v48  ;;  %v114_v53 = vmul.f32 %v95_v14, %v77_v49  ;;  %v115_v54 = vmul.f32 %v95_v14, %v81_v50 }
  0x89   :  { %v172_v33 = vpop.permute.xlu1 %171 }
  0x8a   :  { %v167_v34 = vpop.permute.xlu0 %166  ;;  %v180_v39 = vmul.f32 %v172_v33, %v769_v43  ;;  %v181_v40 = vmul.f32 %v172_v33, %v771_v44  ;;  %v188_v41 = vmul.f32 %v172_v33, %v773_v45  ;;  %v189_v42 = vmul.f32 %v172_v33, %v775_v46 }
  0x8b   :  { %v178_v55 = vmul.f32 %v167_v34, %v769_v43  ;;  %v179_v56 = vmul.f32 %v167_v34, %v771_v44  ;;  %v186_v57 = vmul.f32 %v167_v34, %v773_v45  ;;  %v187_v58 = vmul.f32 %v167_v34, %v775_v46 }
  0x8c   :  { %v196_v48 = vadd.f32 %v180_v39, %v108_v35  ;;  %v197_v49 = vadd.f32 %v181_v40, %v109_v36  ;;  %v204_v50 = vadd.f32 %v188_v41, %v116_v37  ;;  %v205_v43 = vadd.f32 %v189_v42, %v117_v38 }
  0x8d   :  { %v250_v59 = vpop.permute.xlu1 %249  ;;  %v194_v1 = vadd.f32 %v178_v55, %v106_v51  ;;  %v195_v2 = vadd.f32 %v179_v56, %v107_v52  ;;  %v202_v3 = vadd.f32 %v186_v57, %v114_v53  ;;  %v203_v4 = vadd.f32 %v187_v58, %v115_v54 }
  0x8e   :  { %v245_v60 = vpop.permute.xlu0 %244  ;;  %v264_v61 = vmul.f32 %v250_v59, %v785_v15  ;;  %v265_v62 = vmul.f32 %v250_v59, %v787_v16  ;;  %v272_v63 = vmul.f32 %v250_v59, %v789_v17  ;;  %v273_v47 = vmul.f32 %v250_v59, %v791_v18 }
  0x8f   :  { %v262_v44 = vmul.f32 %v245_v60, %v785_v15  ;;  %v263_v45 = vmul.f32 %v245_v60, %v787_v16  ;;  %v270_v46 = vmul.f32 %v245_v60, %v789_v17  ;;  %v271_v0 = vmul.f32 %v245_v60, %v791_v18 }
  0x90   :  { %v280_v7 = vadd.f32 %v264_v61, %v192_v29  ;;  %v281_v8 = vadd.f32 %v265_v62, %v193_v30  ;;  %v288_v9 = vadd.f32 %v272_v63, %v200_v31  ;;  %v289_v10 = vadd.f32 %v273_v47, %v201_v32 }
  0x91   :  { %v260_v5 = vpop.permute.xlu1 %259  ;;  %v278_v33 = vadd.f32 %v262_v44, %v190_v25  ;;  %v279_v34 = vadd.f32 %v263_v45, %v191_v26  ;;  %v286_v35 = vadd.f32 %v270_v46, %v198_v27  ;;  %v287_v36 = vadd.f32 %v271_v0, %v199_v28 }
  0x92   :  { %v255_v6 = vpop.permute.xlu0 %254  ;;  %v268_v11 = vmul.f32 %v260_v5, %v785_v15  ;;  %v269_v12 = vmul.f32 %v260_v5, %v787_v16  ;;  %v276_v13 = vmul.f32 %v260_v5, %v789_v17  ;;  %v277_v14 = vmul.f32 %v260_v5, %v791_v18 }
  0x93   :  { %v266_v37 = vmul.f32 %v255_v6, %v785_v15  ;;  %v267_v38 = vmul.f32 %v255_v6, %v787_v16  ;;  %v274_v29 = vmul.f32 %v255_v6, %v789_v17  ;;  %v275_v30 = vmul.f32 %v255_v6, %v791_v18 }
  0x94   :  { %v284_v26 = vadd.f32 %v268_v11, %v196_v48  ;;  %v285_v27 = vadd.f32 %v269_v12, %v197_v49  ;;  %v829_v28 = vadd.f32 %v276_v13, %v204_v50  ;;  %v831_v15 = vadd.f32 %v277_v14, %v205_v43 }
  0x95   :  { %v338_v31 = vpop.permute.xlu1 %337  ;;  %v282_v51 = vadd.f32 %v266_v37, %v194_v1  ;;  %v283_v52 = vadd.f32 %v267_v38, %v195_v2  ;;  %v290_v53 = vadd.f32 %v274_v29, %v202_v3  ;;  %v291_v54 = vadd.f32 %v275_v30, %v203_v4 }
  0x96   :  { %v333_v32 = vpop.permute.xlu0 %332  ;;  %v352_v39 = vmul.f32 %v338_v31, %v793_v19  ;;  %v353_v40 = vmul.f32 %v338_v31, %v795_v20  ;;  %v360_v41 = vmul.f32 %v338_v31, %v797_v23  ;;  %v361_v25 = vmul.f32 %v338_v31, %v799_v24 }
  0x97   :  { %v350_v16 = vmul.f32 %v333_v32, %v793_v19  ;;  %v351_v17 = vmul.f32 %v333_v32, %v795_v20  ;;  %v358_v18 = vmul.f32 %v333_v32, %v797_v23  ;;  %v359_v42 = vmul.f32 %v333_v32, %v799_v24 }
  0x98   :  { %v368_v57 = vadd.f32 %v352_v39, %v280_v7  ;;  %v369_v58 = vadd.f32 %v353_v40, %v281_v8  ;;  %v376_v59 = vadd.f32 %v360_v41, %v288_v9  ;;  %v377_v60 = vadd.f32 %v361_v25, %v289_v10 }
  0x99   :  { %v348_v55 = vpop.permute.xlu1 %347  ;;  %v366_v48 = vadd.f32 %v350_v16, %v278_v33  ;;  %v367_v49 = vadd.f32 %v351_v17, %v279_v34  ;;  %v374_v50 = vadd.f32 %v358_v18, %v286_v35  ;;  %v375_v43 = vadd.f32 %v359_v42, %v287_v36 }
  0x9a   :  { %v343_v56 = vpop.permute.xlu0 %342  ;;  %v356_v44 = vmul.f32 %v348_v55, %v793_v19  ;;  %v357_v45 = vmul.f32 %v348_v55, %v795_v20  ;;  %v364_v31 = vmul.f32 %v348_v55, %v797_v23  ;;  %v365_v41 = vmul.f32 %v348_v55, %v799_v24 }
  0x9b   :  { %v354_v61 = vmul.f32 %v343_v56, %v793_v19  ;;  %v355_v62 = vmul.f32 %v343_v56, %v795_v20  ;;  %v362_v63 = vmul.f32 %v343_v56, %v797_v23  ;;  %v363_v47 = vmul.f32 %v343_v56, %v799_v24 }
  0x9c   :  { %v372_v40 = vadd.f32 %v356_v44, %v284_v26  ;;  %v373_v17 = vadd.f32 %v357_v45, %v285_v27  ;;  %v380_v23 = vadd.f32 %v364_v31, %v829_v28  ;;  %v381_v26 = vadd.f32 %v365_v41, %v831_v15  ;;  %v634_v28 = vld [vmem:[%s867_s3 + $0x8] sm:$0xff]   ;;  %v635_v15 = vld [vmem:[%s867_s3] sm:$0xff]  }
  0x9d   :  { %v390_v46 = vpop.permute.xlu1 %389  ;;  %v370_v1 = vadd.f32 %v354_v61, %v282_v51  ;;  %v371_v2 = vadd.f32 %v355_v62, %v283_v52  ;;  %v378_v9 = vadd.f32 %v362_v63, %v290_v53  ;;  %v379_v10 = vadd.f32 %v363_v47, %v291_v54 }
  0x9e   :  { %v385_v0 = vpop.permute.xlu0 %384  ;;  %v404_v3 = vadd.f32 %v390_v46, %v368_v57  ;;  %v405_v4 = vadd.f32 %v390_v46, %v369_v58  ;;  %v412_v20 = vadd.f32 %v390_v46, %v376_v59  ;;  %v413_v35 = vadd.f32 %v390_v46, %v377_v60 }
  0x9f   :  { %v402_v5 = vadd.f32 %v385_v0, %v366_v48  ;;  %v403_v6 = vadd.f32 %v385_v0, %v367_v49  ;;  %v410_v7 = vadd.f32 %v385_v0, %v374_v50  ;;  %v411_v8 = vadd.f32 %v385_v0, %v375_v43 }
  0xa0   :  { %v420_v11 = vmax.f32 %v404_v3, 0.0  ;;  %v421_v12 = vmax.f32 %v405_v4, 0.0  ;;  %v428_v42 = vmax.f32 %v412_v20, 0.0  ;;  %v429_v51 = vmax.f32 %v413_v35, 0.0 }
  0xa1   :  { %v418_v13 = vmax.f32 %v402_v5, 0.0  ;;  %v419_v14 = vmax.f32 %v403_v6, 0.0  ;;  %v426_v19 = vmax.f32 %v410_v7, 0.0  ;;  %v427_v34 = vmax.f32 %v411_v8, 0.0  ;;  %v400_v36 = vpop.permute.xlu1 %399 }
  0xa2   :  { %v395_v33 = vpop.permute.xlu0 %394  ;;  %v437_v37 = vadd.f32 %v421_v12, %v420_v11  ;;  %v408_v52 = vadd.f32 %v400_v36, %v372_v40  ;;  %v409_v57 = vadd.f32 %v400_v36, %v373_v17  ;;  %v449_v24 = vadd.f32 %v429_v51, %v428_v42 }
  0xa3   :  { %v434_v38 = vadd.f32 %v419_v14, %v418_v13  ;;  %v406_v29 = vadd.f32 %v395_v33, %v370_v1  ;;  %v407_v30 = vadd.f32 %v395_v33, %v371_v2  ;;  %v414_v32 = vadd.f32 %v395_v33, %v378_v9 }
  0xa4   :  { %v415_v39 = vadd.f32 %v395_v33, %v379_v10  ;;  %438 = vadd.xlane.f32.xlu1 %v437_v37  ;;  %v446_v18 = vadd.f32 %v427_v34, %v426_v19  ;;  %v416_v55 = vadd.f32 %v400_v36, %v380_v23  ;;  %v424_v59 = vmax.f32 %v408_v52, 0.0 }
  0xa5   :  { %435 = vadd.xlane.f32.xlu0 %v434_v38  ;;  %v422_v25 = vmax.f32 %v406_v29, 0.0  ;;  %v423_v16 = vmax.f32 %v407_v30, 0.0  ;;  %v430_v54 = vmax.f32 %v414_v32, 0.0  ;;  %v425_v60 = vmax.f32 %v409_v57, 0.0 }
  0xa6   :  { %v431_v56 = vmax.f32 %v415_v39, 0.0  ;;  %v417_v27 = vadd.f32 %v400_v36, %v381_v26  ;;  %v432_v62 = vmax.f32 %v416_v55, 0.0  ;;  %v659_v48 = vmov 0.0   ;;  %v613_v55 = vld [vmem:[%s868_s4] ss:$0 sm:$0xff] }
  0xa7   :  { %v440_v53 = vadd.f32 %v423_v16, %v422_v25  ;;  %v443_v61 = vadd.f32 %v425_v60, %v424_v59  ;;  %620 = vmatprep.subr.bf16.mxu0 %v659_v48  ;;  %624 = vmatprep.mubr.msk.bf16.mxu0 %vm660_vm0, %v659_v48  ;;  %v494_v45 = vand.u32 127, %v46_v21 }
  0xa8   :  { %v452_v58 = vadd.f32 %v431_v56, %v430_v54  ;;  %v433_v63 = vmax.f32 %v417_v27, 0.0  ;;  %621 = vmatpush3.bf16.msra.mxu0 %v634_v28 }
  0xa9   :  { %447 = vadd.xlane.f32.xlu0 %v446_v18  ;;  %441 = vadd.xlane.f32.xlu1 %v440_v53  ;;  %v499_v3 = vadd.s32 4294967288, %v494_v45  ;;  %v506_v6 = vadd.s32 4294967280, %v494_v45  ;;  %v497_v9 = vsub.s32 %v494_v45, %v753_v22  ;;  %v513_v21 = vadd.s32 4294967272, %v494_v45 }
  0xaa   :  { %v455_v47 = vadd.f32 %v433_v63, %v432_v62  ;;  %622 = vmatprep.subr.bf16.mxu0 %v659_v48 }
  0xab   :  { %v502_v12 = vsub.s32 %v499_v3, %v753_v22  ;;  %v509_v19 = vsub.s32 %v506_v6, %v753_v22  ;;  %v516_v32 = vsub.s32 %v513_v21, %v753_v22 }
  0xac   :  { %623 = vmatpush3.bf16.msra.mxu0 %v635_v15 }
  0xad   :  { %450 = vadd.xlane.f32.xlu0 %v449_v24  ;;  %453 = vadd.xlane.f32.xlu1 %v452_v58 }
  0xb1   :  { %444 = vadd.xlane.f32.xlu0 %v443_v61 }
  0xb5   :  { %456 = vadd.xlane.f32.xlu0 %v455_v47 }
 0x12d   :  { %v439_v50 = vpop.xlane.xlu1 %438 }
 0x12e   :  { %v436_v49 = vpop.xlane.xlu0 %435  ;;  %v459_v44 = vmul.f32 0.00390625, %v439_v50 }
 0x12f   :  { %v458_v46 = vmul.f32 0.00390625, %v436_v49 }
 0x131   :  { %v466_v4 = vpack.c.bf16 %v459_v44, %v458_v46 }
 0x132   :  { %v448_v43 = vpop.xlane.xlu0 %447  ;;  %v442_v0 = vpop.xlane.xlu1 %441 }
 0x133   :  { %v462_v5 = vmul.f32 0.00390625, %v448_v43  ;;  %v460_v10 = vmul.f32 0.00390625, %v442_v0  ;;  %v485_v13 = vunpack.c.l.b16 %v466_v4  ;;  %v486_v14 = vunpack.c.h.b16 %v466_v4 }
 0x135   :  { %v498_v30 = vrot.slane %v485_v13, %v497_v9  ;;  %v503_v31 = vrot.slane %v486_v14, %v502_v12 }
 0x136   :  { %v451_v1 = vpop.xlane.xlu0 %450  ;;  %v454_v33 = vpop.xlane.xlu1 %453 }
 0x137   :  { %v463_v2 = vmul.f32 0.00390625, %v451_v1  ;;  %v464_v37 = vmul.f32 0.00390625, %v454_v33  ;;  %v505_v42 = vsel %vm504_vm1, %v503_v31, %v498_v30 }
 0x139   :  { %v468_v7 = vpack.c.bf16 %v463_v2, %v462_v5 }
 0x13a   :  { %v445_v8 = vpop.xlane.xlu0 %444 }
 0x13b   :  { %v461_v11 = vmul.f32 0.00390625, %v445_v8  ;;  %v489_v20 = vunpack.c.l.b16 %v468_v7  ;;  %v490_v35 = vunpack.c.h.b16 %v468_v7 }
 0x13d   :  { %v467_v34 = vpack.c.bf16 %v461_v11, %v460_v10  ;;  %v523_v25 = vrot.slane %v489_v20, %v497_v9  ;;  %v527_v16 = vrot.slane %v490_v35, %v502_v12 }
 0x13e   :  { %v457_v36 = vpop.xlane.xlu0 %456 }
 0x13f   :  { %v487_v38 = vunpack.c.l.b16 %v467_v34  ;;  %v465_v29 = vmul.f32 0.00390625, %v457_v36  ;;  %v488_v39 = vunpack.c.h.b16 %v467_v34  ;;  %v528_v56 = vsel %vm504_vm1, %v527_v16, %v523_v25 }
 0x141   :  { %v510_v40 = vrot.slane %v487_v38, %v509_v19  ;;  %v469_v41 = vpack.c.bf16 %v465_v29, %v464_v37  ;;  %v517_v51 = vrot.slane %v488_v39, %v516_v32 }
 0x143   :  { %v491_v17 = vunpack.c.l.b16 %v469_v41  ;;  %v492_v18 = vunpack.c.h.b16 %v469_v41  ;;  %v512_v52 = vsel %vm511_vm2, %v510_v40, %v505_v42 }
 0x144   :  { %v519_v23 = vsel %vm518_vm3, %v517_v51, %v512_v52 }
 0x145   :  { %v532_v53 = vrot.slane %v491_v17, %v509_v19  ;;  %v537_v54 = vrot.slane %v492_v18, %v516_v32 }
 0x147   :  { %v533_v57 = vsel %vm511_vm2, %v532_v53, %v528_v56 }
 0x148   :  { %v538_v22 = vsel %vm518_vm3, %v537_v54, %v533_v57 }
 0x149   :  { %v540_v26 = vsel %vm539_vm4, %v538_v22, %v519_v23 }
 0x14a   :  { %v541_v24 = vpack.c.b16 %v540_v26, %v540_v26 }
 0x14c   :  { %625 = vmatmul.mubr.msk.bf16.vlgmr.msra.gmra.mxu0 %vm554_vm5, %v541_v24 }
 0x20c   :  { %v592_v58 = vpop.f32.mrf.mxu0 }
 0x20d   :  { %v593_v59 = vadd.f32 %v613_v55, %v592_v58 }
 0x20e   :  { %v626_v60 = vpop.f32.mrf.mxu0 }
 0x20f   :  { %598 = vst [vmem:[#allocation2] sm:$0x3] %v593_v59 }
 0x210   :  { %v595_v27 = vpop.f32.mrf.mxu0 }
 0x211   :  { %647 = shalt.err (!%p644_p4)
}
 0x212   :  { %608 = dma.vmem_to_hbm [thread:$0]  %s606_s15, 32, %s869_s5, [#allocation3]   ;;  %v627_v61 = vpop.f32.mrf.mxu0 }
 0x213   :  { %656 = dma.done.wait [#allocation3], 32  }
 0x214   :  { %657 = vsyncadd [#allocation3], 4294967264 }
 0x215   :  { %612 = vsyncpa [#allocation3], 1 }

</bundles_post_ra>
